<compile_context>
chip_gen: v6e
topology: v6e:2x2x1
jax: 0.10.0
libtpu: 0.0.40
codegen_flags: <defaults>
</compile_context>

<pallas_src>
import functools

import jax
import jax.numpy as jnp
from jax import lax
from jax.experimental import pallas as pl
from jax.experimental.pallas import tpu as pltpu

_LANES = 128
# 8192 * 128 * 4B = 4 MiB per f32 input tile; amortizes the ~0.35us per-grid-step
# overhead (measured ~86%+ of HBM roofline at 2-4 MiB tiles) while staying well
# inside every generation's scoped VMEM budget when double-buffered.
_MAX_TILE_ROWS = 8192
# v7x has 2 TensorCores per chip; the 'parallel' core axis shards the work
# across them.  On 1-TC chips (v5e/v6e) this is structurally a no-op.
_NUM_CORES = 2


def _focal_loss_kernel(x_ref, t_ref, part_ref, *,
                       rows_per_core, tile_rows, ragged_last,
                       alpha, gamma, binary_targets):
    i = pl.program_id(1)
    last = pl.num_programs(1) - 1

    @pl.when(i == 0)
    def _init():
        # Per-core lane-wide partial lives in the (resident) output block.
        part_ref[...] = jnp.zeros_like(part_ref)

    p = x_ref[...].astype(jnp.float32)
    t = t_ref[...].astype(jnp.float32)

    if binary_targets:
        # Fast path (exact for targets in {0,1}): 1 transcendental / element.
        pt = t * p + (1.0 - t) * (1.0 - p)
        bce = -jnp.maximum(jnp.log(pt), -100.0)
    else:
        # Exact PyTorch semantics for soft labels:
        #   BCELoss(reduction='none') = -(t*log(p) + (1-t)*log(1-p)),
        #   with the log terms clamped at -100 (torch.nn.BCELoss behaviour).
        # NOTE: the clamp also neutralizes the p=1,t=1 tail padding
        # (log1p(-1) = -inf -> -100, multiplied by (1-t)=0 -> 0).
        log_p = jnp.maximum(jnp.log(p), -100.0)
        log_1mp = jnp.maximum(jnp.log1p(-p), -100.0)
        neg_bce = t * log_p + (1.0 - t) * log_1mp
        bce = -neg_bce
        pt = jnp.exp(neg_bce)

    one_minus_pt = 1.0 - pt
    if float(gamma).is_integer():
        focal_w = lax.integer_pow(one_minus_pt, int(gamma))
    else:
        focal_w = jnp.power(one_minus_pt, gamma)
    f_loss = focal_w * bce
    if alpha != 1.0:
        f_loss = alpha * f_loss

    if ragged_last:
        # Only the final row-tile of each core's slab has out-of-bounds rows.
        @pl.when(i != last)
        def _acc_full():
            part_ref[...] += jnp.sum(f_loss, axis=0, keepdims=True)

        @pl.when(i == last)
        def _acc_masked():
            valid_rows = rows_per_core - i * tile_rows
            row_idx = lax.broadcasted_iota(jnp.int32, f_loss.shape, 0)
            masked = jnp.where(row_idx < valid_rows, f_loss, 0.0)
            part_ref[...] += jnp.sum(masked, axis=0, keepdims=True)
    else:
        part_ref[...] += jnp.sum(f_loss, axis=0, keepdims=True)


def focal_loss(inputs, targets, *, alpha=1.0, gamma=2.0, reduction="mean",
               binary_targets=False):
    """Pallas TPU FocalLoss forward.

    `inputs` are probabilities in (0, 1) (as expected by nn.BCELoss).
    bf16 inputs/targets are accepted as-is (the f32 cast happens in-kernel).
    Set `binary_targets=True` only when targets are exactly {0,1}.
    """
    assert inputs.shape == targets.shape
    assert reduction in ("mean", "sum")  # TODO(synk): 'none' not wired up

    n = int(inputs.size)
    x = inputs.reshape(-1)
    t = targets.reshape(-1)

    # Pad the tail (< NUM_CORES*128 elems) with zero-loss values (p=1, t=1)
    # so that lane raggedness and the per-core row split never need masking.
    chunk = _NUM_CORES * _LANES
    pad = (-n) % chunk
    if pad:
        x = jnp.pad(x, (0, pad), constant_values=1)
        t = jnp.pad(t, (0, pad), constant_values=1)

    rows = int(x.size) // _LANES
    rows_per_core = rows // _NUM_CORES
    x = x.reshape(_NUM_CORES, rows_per_core, _LANES)
    t = t.reshape(_NUM_CORES, rows_per_core, _LANES)

    if rows_per_core <= _MAX_TILE_ROWS:
        tile_rows = rows_per_core      # block == full slab: no row raggedness
        tiles_per_core = 1
        ragged_last = False
    else:
        tile_rows = _MAX_TILE_ROWS
        tiles_per_core = pl.cdiv(rows_per_core, tile_rows)
        ragged_last = (rows_per_core % tile_rows) != 0

    kernel = functools.partial(
        _focal_loss_kernel,
        rows_per_core=rows_per_core, tile_rows=tile_rows,
        ragged_last=ragged_last,
        alpha=float(alpha), gamma=float(gamma),
        binary_targets=bool(binary_targets),
    )

    partials = pl.pallas_call(
        kernel,
        out_shape=jax.ShapeDtypeStruct((_NUM_CORES, 1, _LANES), jnp.float32),
        grid_spec=pltpu.PrefetchScalarGridSpec(
            num_scalar_prefetch=0,
            grid=(_NUM_CORES, tiles_per_core),
            in_specs=[
                pl.BlockSpec((None, tile_rows, _LANES), lambda c, i: (c, i, 0)),
                pl.BlockSpec((None, tile_rows, _LANES), lambda c, i: (c, i, 0)),
            ],
            out_specs=pl.BlockSpec((None, 1, _LANES), lambda c, i: (c, 0, 0)),
        ),
        compiler_params=pltpu.CompilerParams(
            dimension_semantics=("parallel", "arbitrary"),
            # 16 MiB of user buffers (f32) under a 32 MiB cap: safe on v5e/v6e
            # (128 MiB physical) and leaves headroom on v7x (64 MiB physical).
            vmem_limit_bytes=32 * 1024 * 1024,
        ),
    )(x, t)

    # Tiny epilogue: (NUM_CORES, 1, 128) -> scalar (negligible XLA reduce).
    total = jnp.sum(partials)
    if reduction == "mean":
        # NOTE: f32 divisor; for n > ~2^24 this carries ~1e-7 relative error.
        return total / jnp.float32(n)
    return total


def _focal_loss_ref(inputs, targets, alpha=1.0, gamma=2.0, reduction="mean"):
    p = inputs.astype(jnp.float32)
    t = targets.astype(jnp.float32)
    log_p = jnp.maximum(jnp.log(p), -100.0)
    log_1mp = jnp.maximum(jnp.log(1.0 - p), -100.0)
    bce = -(t * log_p + (1.0 - t) * log_1mp)
    pt = jnp.exp(-bce)
    f = alpha * (1.0 - pt) ** gamma * bce
    return jnp.mean(f) if reduction == "mean" else jnp.sum(f)


if __name__ == "__main__":
    key = jax.random.PRNGKey(0)
    k1, k2, k3, k4, k5, k6 = jax.random.split(key, 6)

    # Small NCHW case: batch=2, channels=4, spatial=16x16 (single tile/core).
    logits = jax.random.normal(k1, (2, 4, 16, 16), dtype=jnp.float32)
    inputs = jax.nn.sigmoid(logits)            # probabilities, as BCELoss expects
    targets = jax.random.bernoulli(k2, 0.5, (2, 4, 16, 16)).astype(jnp.float32)

    out = jax.block_until_ready(
        focal_loss(inputs, targets, alpha=1.0, gamma=2.0, reduction="mean"))
    ref = jax.block_until_ready(_focal_loss_ref(inputs, targets))
    assert jnp.allclose(out, ref, rtol=2e-5, atol=1e-6), (out, ref)

    # Mid-size odd-shaped case: exercises the lane-tail padding + 2-core split.
    logits2 = jax.random.normal(k3, (3, 300, 300), dtype=jnp.float32)
    inputs2 = jax.nn.sigmoid(logits2)
    targets2 = jax.random.bernoulli(k4, 0.5, (3, 300, 300)).astype(jnp.float32)

    out2 = jax.block_until_ready(
        focal_loss(inputs2, targets2, alpha=1.0, gamma=2.0, reduction="mean"))
    ref2 = jax.block_until_ready(_focal_loss_ref(inputs2, targets2))
    assert jnp.allclose(out2, ref2, rtol=2e-5, atol=1e-6), (out2, ref2)

    # Binary-targets fast path (1 transcendental/element) on the same data.
    out2_fast = jax.block_until_ready(
        focal_loss(inputs2, targets2, reduction="mean", binary_targets=True))
    assert jnp.allclose(out2_fast, ref2, rtol=2e-5, atol=1e-6), (out2_fast, ref2)

    # Tiny case with a ragged lane tail AND an odd row count (row pad to cores),
    # plus reduction='sum'.
    logits3 = jax.random.normal(k5, (3, 129), dtype=jnp.float32)
    inputs3 = jax.nn.sigmoid(logits3)
    targets3 = jax.random.bernoulli(k6, 0.5, (3, 129)).astype(jnp.float32)

    out3 = jax.block_until_ready(
        focal_loss(inputs3, targets3, reduction="sum"))
    ref3 = jax.block_until_ready(_focal_loss_ref(inputs3, targets3, reduction="sum"))
    assert jnp.allclose(out3, ref3, rtol=2e-5, atol=1e-5), (out3, ref3)

    print("KERNEL_OK")
</pallas_src>

<mosaic_0001>
module attributes {stable_mosaic.version = 11 : i64} {
  func.func @_focal_loss_kernel(%arg0: i32, %arg1: i32, %arg2: memref<1x8x128xf32, #tpu.memory_space<vmem>>, %arg3: memref<1x8x128xf32, #tpu.memory_space<vmem>>, %arg4: memref<1x1x128xf32, #tpu.memory_space<vmem>>) attributes {dimension_semantics = [#tpu.dimension_semantics<parallel>, #tpu.dimension_semantics<arbitrary>], iteration_bounds = array<i64: 2, 1>, scalar_prefetch = 0 : i64, scratch_operands = 0 : i64, tpu.core_type = #tpu.core_type<tc>, window_params = [{transform_indices = @transform_0, window_bounds = array<i64: 1, 8, 128>}, {transform_indices = @transform_1, window_bounds = array<i64: 1, 8, 128>}, {transform_indices = @transform_2, window_bounds = array<i64: 1, 1, 128>}]} {
    %c0_i32 = arith.constant 0 : i32
    %0 = arith.cmpi eq, %arg1, %c0_i32 : i32
    %1 = arith.extui %0 : i1 to i32
    %c0_i32_0 = arith.constant 0 : i32
    %2 = arith.cmpi ne, %1, %c0_i32_0 : i32
    scf.if %2 {
      %cst_18 = arith.constant 0.000000e+00 : f32
      %35 = vector.broadcast %cst_18 : f32 to vector<1x128xf32>
      %c0_19 = arith.constant 0 : index
      %c0_20 = arith.constant 0 : index
      %c0_21 = arith.constant 0 : index
      %36 = vector.load %arg4[%c0_19, %c0_20, %c0_21] : memref<1x1x128xf32, #tpu.memory_space<vmem>>, vector<1x1x128xf32>
      %37 = vector.shape_cast %36 : vector<1x1x128xf32> to vector<1x128xf32>
      %38 = vector.shape_cast %35 : vector<1x128xf32> to vector<1x1x128xf32>
      tpu.vector_store %arg4[%c0_19, %c0_20, %c0_21], %38 {strides = array<i32>} : memref<1x1x128xf32, #tpu.memory_space<vmem>>, vector<1x1x128xf32>,
    } else {
    }
    %c0 = arith.constant 0 : index
    %c0_1 = arith.constant 0 : index
    %c0_2 = arith.constant 0 : index
    %3 = vector.load %arg2[%c0, %c0_1, %c0_2] : memref<1x8x128xf32, #tpu.memory_space<vmem>>, vector<1x8x128xf32>
    %4 = vector.shape_cast %3 : vector<1x8x128xf32> to vector<8x128xf32>
    %c0_3 = arith.constant 0 : index
    %c0_4 = arith.constant 0 : index
    %c0_5 = arith.constant 0 : index
    %5 = vector.load %arg3[%c0_3, %c0_4, %c0_5] : memref<1x8x128xf32, #tpu.memory_space<vmem>>, vector<1x8x128xf32>
    %6 = vector.shape_cast %5 : vector<1x8x128xf32> to vector<8x128xf32>
    %7 = math.log %4 : vector<8x128xf32>
    %cst = arith.constant -1.000000e+02 : f32
    %8 = vector.broadcast %cst : f32 to vector<8x128xf32>
    %9 = arith.maximumf %7, %8 : vector<8x128xf32>
    %cst_6 = arith.constant 0.000000e+00 : f32
    %10 = vector.broadcast %cst_6 : f32 to vector<8x128xf32>
    %11 = arith.subf %10, %4 : vector<8x128xf32>
    %12 = math.log1p %11 : vector<8x128xf32>
    %cst_7 = arith.constant -1.000000e+02 : f32
    %13 = vector.broadcast %cst_7 : f32 to vector<8x128xf32>
    %14 = arith.maximumf %12, %13 : vector<8x128xf32>
    %15 = arith.mulf %6, %9 : vector<8x128xf32>
    %cst_8 = arith.constant 1.000000e+00 : f32
    %16 = vector.broadcast %cst_8 : f32 to vector<8x128xf32>
    %17 = arith.subf %16, %6 : vector<8x128xf32>
    %18 = arith.mulf %17, %14 : vector<8x128xf32>
    %19 = arith.addf %15, %18 : vector<8x128xf32>
    %cst_9 = arith.constant 0.000000e+00 : f32
    %20 = vector.broadcast %cst_9 : f32 to vector<8x128xf32>
    %21 = arith.subf %20, %19 : vector<8x128xf32>
    %22 = math.exp %19 : vector<8x128xf32>
    %cst_10 = arith.constant 1.000000e+00 : f32
    %23 = vector.broadcast %cst_10 : f32 to vector<8x128xf32>
    %24 = arith.subf %23, %22 : vector<8x128xf32>
    %25 = arith.mulf %24, %24 : vector<8x128xf32>
    %26 = arith.mulf %25, %21 : vector<8x128xf32>
    %c0_11 = arith.constant 0 : index
    %c0_12 = arith.constant 0 : index
    %c0_13 = arith.constant 0 : index
    %27 = vector.load %arg4[%c0_11, %c0_12, %c0_13] : memref<1x1x128xf32, #tpu.memory_space<vmem>>, vector<1x1x128xf32>
    %28 = vector.shape_cast %27 : vector<1x1x128xf32> to vector<1x128xf32>
    %cst_14 = arith.constant dense<0.000000e+00> : vector<128xf32>
    %29 = vector.multi_reduction <add>, %26, %cst_14 [0] : vector<8x128xf32> to vector<128xf32>
    %30 = vector.shape_cast %29 : vector<128xf32> to vector<1x128xf32>
    %31 = arith.addf %28, %30 : vector<1x128xf32>
    %c0_15 = arith.constant 0 : index
    %c0_16 = arith.constant 0 : index
    %c0_17 = arith.constant 0 : index
    %32 = vector.load %arg4[%c0_15, %c0_16, %c0_17] : memref<1x1x128xf32, #tpu.memory_space<vmem>>, vector<1x1x128xf32>
    %33 = vector.shape_cast %32 : vector<1x1x128xf32> to vector<1x128xf32>
    %34 = vector.shape_cast %31 : vector<1x128xf32> to vector<1x1x128xf32>
    tpu.vector_store %arg4[%c0_15, %c0_16, %c0_17], %34 {strides = array<i32>} : memref<1x1x128xf32, #tpu.memory_space<vmem>>, vector<1x1x128xf32>,
    return
  }
  func.func @transform_0(%arg0: i32, %arg1: i32) -> (i32, i32, i32) {
    %c0_i32 = arith.constant 0 : i32
    %c0_i32_0 = arith.constant 0 : i32
    return %arg0, %arg1, %c0_i32 : i32, i32, i32
  }
  func.func @transform_1(%arg0: i32, %arg1: i32) -> (i32, i32, i32) {
    %c0_i32 = arith.constant 0 : i32
    %c0_i32_0 = arith.constant 0 : i32
    return %arg0, %arg1, %c0_i32 : i32, i32, i32
  }
  func.func @transform_2(%arg0: i32, %arg1: i32) -> (i32, i32, i32) {
    %c0_i32 = arith.constant 0 : i32
    %c0_i32_0 = arith.constant 0 : i32
    %c0_i32_1 = arith.constant 0 : i32
    return %arg0, %c0_i32, %c0_i32_0 : i32, i32, i32
  }
}

</mosaic_0001>

<bundles_post_ra>
// kernel: tpu_custom_call.1
= control target key start
LH: loop header
LB: loop body
LE: loop exit
PB: predicated region body
PF: predicated region fallthrough
CT: control target
= control target key end

     0   :  { %7 = vsyncpa [#allocation3], 0  ;;  %s782_s0 = inlined_call_operand.hbm [shape: f32[2,8,128], index: 0, kind: input, shape index: {}]   ;;  %s783_s1 = inlined_call_operand.hbm [shape: f32[2,8,128], index: 1, kind: input, shape index: {}]   ;;  %s784_s2 = inlined_call_operand.hbm [shape: f32[2,1,128], index: 2, kind: output, shape index: {}]  }
   0x1   :  { %9 = vsyncpa [#allocation3 + $0x1], 0 }
   0x2   :  { %10 = vsyncpa [#allocation6], 0 }
   0x3   :  { %12 = vsyncpa [#allocation6 + $0x1], 0 }
   0x4   :  { %13 = vsyncpa [#allocation4], 0 }
   0x5   :  { %15 = vsyncpa [#allocation4 + $0x1], 0  ;;  %s614_s9 = smov 0   ;;  %s616_s10 = smov 0  }
   0x6   :  { %s618_s11 = smov 0   ;;  %s620_s12 = smov 0  }
   0x7   :  { %s622_s13 = smov 0   ;;  %s624_s14 = smov 0  }
   0x8 LB: > { %s365_s15 = sadd.s32 4294967295, %s593_s14   ;;  %s366_s16 = sadd.s32 4294967294, %s593_s14   ;;  %s593_s14 = sphi %s624_s14, %s21_s14   ;;  %s589_s13 = sphi %s622_s13, %s796_s13   ;;  %s585_s12 = sphi %s620_s12, %s795_s12   ;;  %s581_s11 = sphi %s618_s11, %s794_s11   ;;  %s577_s10 = sphi %s616_s10, %s793_s10   ;;  %s573_s9 = sphi %s614_s9, %s792_s9  }
   0x9   : > { %s33_s17 = sadd.s32 1, %s589_s13  ;;  %s42_s18 = sadd.s32 1, %s581_s11 }
   0xa   : > { %p35_p0 = scmp.ge.s32.totalorder %s33_s17, 2  ;;  %p49_p1 = scmp.ne.s32.totalorder %s581_s11, %s577_s10 }
   0xb   : > { %p50_p2 = scmp.eq.s32.totalorder %s593_s14, 0  ;;  %p55_p3 = scmp.ne.s32.totalorder %s577_s10, %s573_s9 }
   0xc   : > { %s798_s17 = smov (%p35_p0, %s33_s17), 0  ;;  %p56_p5 = scmp.eq.s32.totalorder %s365_s15, 0 }
   0xd   : > { %p655_p4 = por %p50_p2, %p49_p1  ;;  %s37_s20 = ssub.s32 %s589_s13, %s798_s17 }
   0xe   : > { %p107_p6 = scmp.eq.s32.totalorder %s365_s15, 1  ;;  %p40_p7 = scmp.eq.s32.totalorder %s37_s20, 0 }
   0xf   : > { %p661_p8 = por %p56_p5, %p55_p3  ;;  %p113_p10 = scmp.eq.s32.totalorder %s366_s16, 1 }
  0x10   : > { %p665_p9 = por %p107_p6, %p49_p1  ;;  %p396_p13 = scmp.lt.s32.totalorder %s593_s14, 2 }
  0x11   : > { %s670_s23 = scalar_select %p40_p7, %s581_s11, %s42_s18  }
  0x12   : > { %p672_p11 = por %p113_p10, %p55_p3  ;;  %s679_s25 = sand.u32 1, %s581_s11  }
  0x13   : > { %s369_s26 = sshll.u32 %s679_s25, 3  ;;  %s370_s27 = sshll.u32 %s589_s13, 7 }
  0x14   : > { %s143_s30 = scalar_lea.hbm %s782_s0, %s370_s27  ;;  %s137_s3 = scalar_lea.vmem [#allocation2], %s369_s26 }
  0x15   : > { %s145_s4 = sshll.u32 %s137_s3, 4  ;;  %p688_p0 = pnand %p396_p13, %p655_p4  ;;  %s146_s4 = int_to_ptr.vmem [resolvable:$true] %s145_s4 }
  0x16   : > { %p373_p1 = scmp.ge.s32.totalorder %s593_s14, 1  ;;  %p169_p2 = scmp.lt.s32.totalorder %s593_s14, 3 }
  0x17   : > { %s134_s6 = scalar_lea.sflag [#allocation3], %s679_s25  ;;  %p455_p3 = pneg %p688_p0 }
  0x18   : > { %s466_s7 = scalar_lea.vmem %s146_s4, 128  ;;  %s595_s8 = smov [#allocation2]  }
  0x19   : > { %p467_p5 = scmp.ne.s32.totalorder %s146_s4, %s466_s7  ;;  %s471_s15 = sshll.u32 %s595_s8, 4  ;;  %s472_s15 = int_to_ptr.vmem [resolvable:$false] %s471_s15 }
  0x1a   : > { %s473_s16 = scalar_lea.vmem %s472_s15, 256  ;;  %p474_p4 = scmp.lt.s32.totalorder %s146_s4, %s472_s15 }
  0x1b   : > { %p469_p6 = pnand %p467_p5, %p455_p3  ;;  %p475_p10 = scmp.lt.s32.totalorder %s473_s16, %s466_s7 }
  0x1d   : > { %p470_p7 = pneg %p469_p6  ;;  %p476_p13 = por %p475_p10, %p474_p4 }
  0x1f   : > { %p477_p12 = pnand %p476_p13, %p470_p7 }
  0x21   : > { %480 = shalt.err (!%p477_p12)
}
  0x22   : > { %388 = dma.hbm_to_vmem [thread:$0]  (!%p688_p0), %s143_s30, 128, %s146_s4, %s134_s6  }
  0x23   : > { %p706_p5 = pnand %p373_p1, %p169_p2  ;;  %s162_s28 = scalar_lea.hbm %s783_s1, %s370_s27 }
  0x24   : > { %s156_s29 = scalar_lea.vmem [#allocation5], %s369_s26  ;;  %s153_s7 = scalar_lea.sflag [#allocation6], %s679_s25 }
  0x25   : > { %s164_s3 = sshll.u32 %s156_s29, 4  ;;  %s596_s30 = smov [#allocation5]   ;;  %s165_s3 = int_to_ptr.vmem [resolvable:$true] %s164_s3 }
  0x26   : > { %s494_s8 = scalar_lea.vmem %s165_s3, 128  ;;  %s499_s4 = sshll.u32 %s596_s30, 4  ;;  %s500_s4 = int_to_ptr.vmem [resolvable:$false] %s499_s4 }
  0x27   : > { %p495_p12 = scmp.ne.s32.totalorder %s165_s3, %s494_s8  ;;  %s501_s6 = scalar_lea.vmem %s500_s4, 256 }
  0x28   : > { %p502_p1 = scmp.lt.s32.totalorder %s165_s3, %s500_s4  ;;  %p503_p2 = scmp.lt.s32.totalorder %s501_s6, %s494_s8 }
  0x29   : > { %p497_p6 = pnand %p495_p12, %p455_p3 }
  0x2a   : > { %p504_p4 = por %p503_p2, %p502_p1 }
  0x2b   : > { %p498_p7 = pneg %p497_p6 }
  0x2d   : > { %p505_p10 = pnand %p504_p4, %p498_p7 }
  0x2f   : > { %508 = shalt.err (!%p505_p10)
}
  0x30   : > { %391 = dma.hbm_to_vmem [thread:$0]  (!%p688_p0), %s162_s28, 128, %s165_s3, %s153_s7  }
  0x31   : > { %173 = sbr.rel (%p706_p5) target bundleno = 134 (0x86), region = 28  ;;  %s722_s25 = sand.u32 (!%p706_p5), 1, %s577_s10  }
  0x32   : > { %s374_s26 = sshll.u32 (!%p706_p5), %s722_s25, 3  ;;  %s176_s27 = scalar_lea.sflag (!%p706_p5), [#allocation3], %s722_s25 }
  0x33   : > { %s179_s15 = scalar_lea.vmem (!%p706_p5), [#allocation2], %s374_s26 }
  0x36   : > { %560 = dma.done.wait (%p661_p8), %s176_s27, 128  }
  0x37   : > { %562 = vsyncadd (%p661_p8), %s176_s27, 4294967168  ;;  %s185_s5 = scalar_lea.sflag [#allocation6], %s722_s25  ;;  %s188_s16 = scalar_lea.vmem [#allocation5], %s374_s26 }
  0x38   : > { %564 = dma.done.wait (%p661_p8), %s185_s5, 128  }
  0x39   : > { %566 = vsyncadd (%p661_p8), %s185_s5, 4294967168  ;;  %s736_s18 = scalar_lea.vmem [#allocation7], %s722_s25  ;;  %v597_v0 = vmov 0.0   ;;  %v218_v1 = vld [vmem:[%s179_s15] sm:$0xff]  ;;  %v219_v9 = vld [vmem:[%s188_s16] sm:$0xff]  ;;  %s376_s21 = sshll.u32 %s585_s12, 4 }
  0x3a   : > { %217 = vst [vmem:[%s736_s18] sm:$0x1] %v597_v0  ;;  %447 = vlog2.f32 %v218_v1  ;;  %v223_v2 = vsub.f32 0.0, %v218_v1  ;;  %v235_v14 = vsub.f32 1.0, %v219_v9  ;;  %s266_s19 = sshll.u32 %s736_s18, 4  ;;  %s264_s29 = scalar_lea.hbm %s784_s2, %s376_s21  ;;  %s267_s19 = int_to_ptr.vmem [resolvable:$true] %s266_s19 }
  0x3b   : > { %s254_s3 = scalar_lea.sflag [#allocation4], %s722_s25  ;;  %s509_s7 = scalar_lea.vmem %s267_s19, 16 }
  0x3c   : > { %v224_v3 = vadd.f32 1.0, %v223_v2  ;;  %v227_v4 = vmul.f32 -0.5, %v223_v2  ;;  %v230_v7 = vand.u32 2147483647, %v223_v2  ;;  %p510_p8 = scmp.ne.s32.totalorder %s267_s19, %s509_s7  ;;  %s598_s8 = smov [#allocation7]  }
  0x3d   : > { %s513_s30 = sshll.u32 %s598_s8, 4  ;;  %s514_s30 = int_to_ptr.vmem [resolvable:$false] %s513_s30 }
  0x3e   : > { %449 = vlog2.f32 %v224_v3  ;;  %v228_v5 = vadd.f32 1.0, %v227_v4  ;;  %vm231_vm0 = vcmp.lt.f32.partialorder %v230_v7, 0.0004427343  ;;  %p511_p0 = pnand %p510_p8, %p665_p9  ;;  %s515_s4 = scalar_lea.vmem %s514_s30, 32 }
  0x3f   : > { %p516_p13 = scmp.lt.s32.totalorder %s267_s19, %s514_s30  ;;  %p517_p5 = scmp.lt.s32.totalorder %s515_s4, %s509_s7 }
  0x40   : > { %v229_v10 = vmul.f32 %v228_v5, %v223_v2  ;;  %p512_p3 = pneg %p511_p0 }
  0x41   : > { %v244_v31 = vld [vmem:[%s736_s18] sm:$0x1]  ;;  %p518_p12 = por %p517_p5, %p516_p13 }
  0x43   : > { %p519_p6 = pnand %p518_p12, %p512_p3 }
  0x47   : > { %v448_v6 = vpop.eup %447 }
  0x48   : > { %v221_v8 = vmul.f32 0.6931472, %v448_v6 }
  0x4a   : > { %v222_v12 = vmax.f32 %v221_v8, -100.0 }
  0x4b   : > { %v450_v11 = vpop.eup %449 }
  0x4c   : > { %v226_v13 = vmul.f32 0.6931472, %v450_v11  ;;  %v234_v17 = vmul.f32 %v222_v12, %v219_v9 }
  0x4e   : > { %v232_v15 = vsel %vm231_vm0, %v229_v10, %v226_v13 }
  0x4f   : > { %v233_v16 = vmax.f32 %v232_v15, -100.0 }
  0x51   : > { %v236_v18 = vmul.f32 %v235_v14, %v233_v16 }
  0x53   : > { %v237_v19 = vadd.f32 %v236_v18, %v234_v17 }
  0x55   : > { %v239_v20 = vmul.f32 1.442695, %v237_v19  ;;  %v238_v22 = vsub.f32 0.0, %v237_v19 }
  0x57   : > { %451 = vpow2.f32 %v239_v20 }
  0x64   : > { %v452_v21 = vpop.eup %451 }
  0x65   : > { %v241_v23 = vsub.f32 1.0, %v452_v21 }
  0x67   : > { %v242_v24 = vmul.f32 %v241_v23, %v241_v23 }
  0x69   : > { %v243_v25 = vmul.f32 %v242_v24, %v238_v22 }
  0x6b   : > { %v245_v26 = vrot.slane %v243_v25, 4 }
  0x6d   : > { %v246_v27 = vadd.f32 %v245_v26, %v243_v25 }
  0x6f   : > { %v247_v28 = vrot.slane %v246_v27, 2 }
  0x71   : > { %v248_v29 = vadd.f32 %v247_v28, %v246_v27 }
  0x73   : > { %v249_v30 = vrot.slane %v248_v29, 1 }
  0x75   : > { %v250_v32 = vadd.f32 %v249_v30, %v248_v29 }
  0x77   : > { %v251_v33 = vadd.f32 %v250_v32, %v244_v31 }
  0x79   : > { %252 = vst [vmem:[%s736_s18] sm:$0x1] %v251_v33 }
  0x7a   : > { %522 = shalt.err (!%p519_p6)
}
  0x7b   : > { %s523_s12 = scalar_lea.hbm %s264_s29, 16  ;;  %s527_s26 = scalar_lea.hbm %s784_s2, 32 }
  0x7c   : > { %p524_p7 = scmp.ne.s32.totalorder %s264_s29, %s523_s12  ;;  %p528_p4 = scmp.lt.s32.totalorder %s264_s29, %s784_s2 }
  0x7d   : > { %p529_p10 = scmp.lt.s32.totalorder %s527_s26, %s523_s12 }
  0x7e   : > { %p525_p1 = pnand %p524_p7, %p665_p9 }
  0x7f   : > { %p530_p8 = por %p529_p10, %p528_p4 }
  0x80   : > { %p526_p2 = pneg %p525_p1 }
  0x82   : > { %p531_p0 = pnand %p530_p8, %p526_p2 }
  0x84   : > { %534 = shalt.err (!%p531_p0)
}
  0x85   : > { %383 = dma.vmem_to_hbm [thread:$0]  (%p665_p9), %s267_s19, 16, %s264_s29, %s254_s3  }
  0x86 PF: > { %s278_s5 = sand.u32 1, %s573_s9   ;;  %p791_p3 = scmp.ge.s32.totalorder %s593_s14, 2 }
  0x87   : > { %s279_s16 = scalar_lea.sflag [#allocation4], %s278_s5 }
  0x88   : > { %p393_p13 = pnand %p791_p3, %p672_p11 }
  0x8a   : > { %p394_p5 = pneg %p393_p13 }
  0x8c   : > { %568 = dma.done.wait (%p394_p5), %s279_s16, 16  }
  0x8d   : > { %570 = vsyncadd (%p394_p5), %s279_s16, 4294967280  ;;  %s21_s14 = sadd.s32 1, %s593_s14   ;;  %s792_s9 = smov %s577_s10 }
  0x8e   : > { %p18_p12 = scmp.ge.s32.totalorder %s21_s14, 4   ;;  %s793_s10 = smov %s581_s11 }
  0x8f   : > { %s794_s11 = smov %s670_s23  ;;  %s795_s12 = smov %s589_s13 }
  0x90   : > { %s796_s13 = smov %s798_s17  ;;  %20 = sbr.rel (!%p18_p12) target bundleno = 8 (0x8), region = 90 }
  0x95   :  { %283 = vsyncpa [#allocation3], 1 }
  0x96   :  { %285 = vsyncpa [#allocation3 + $0x1], 1 }
  0x97   :  { %286 = vsyncpa [#allocation6], 1 }
  0x98   :  { %288 = vsyncpa [#allocation6 + $0x1], 1 }
  0x99   :  { %289 = vsyncpa [#allocation4], 1 }
  0x9a   :  { %291 = vsyncpa [#allocation4 + $0x1], 1 }

</bundles_post_ra>
